<compile_context>
chip_gen: v6e
topology: v6e:2x2x1
jax: 0.10.0
libtpu: 0.0.40
codegen_flags: <defaults>
</compile_context>

<pallas_src>
import jax
import jax.numpy as jnp
from jax.experimental import pallas as pl
from jax.experimental.pallas import tpu as pltpu


def _param_copy_kernel(p_hbm, o_hbm, sem):
    # Forward pass of PerceptModel (materializing variant): copy the whole
    # parameter with one direct HBM->HBM DMA.  No VMEM round-trip.
    cp = pltpu.make_async_copy(p_hbm, o_hbm, sem)
    cp.start()
    cp.wait()


@jax.jit
def _materialize_copy(pred_param: jax.Array) -> jax.Array:
    nbytes = pred_param.size * jnp.dtype(pred_param.dtype).itemsize
    return pl.pallas_call(
        _param_copy_kernel,
        out_shape=jax.ShapeDtypeStruct(pred_param.shape, pred_param.dtype),
        in_specs=[pl.BlockSpec(memory_space=pl.ANY)],    # leave input in HBM
        out_specs=pl.BlockSpec(memory_space=pl.ANY),     # allocate output in HBM
        scratch_shapes=[pltpu.SemaphoreType.DMA(())],    # one DMA-completion sem
        cost_estimate=pl.CostEstimate(
            flops=0, transcendentals=0, bytes_accessed=2 * nbytes),
    )(pred_param)


def percept_model_forward(pred_param: jax.Array, *, materialize: bool = False) -> jax.Array:
    """Pallas implementation of PerceptModel.forward().

    pred_param: the module parameter, shape (1, C, H, W) (already unsqueezed).

    materialize=False (default) matches PyTorch's `return self.pred` exactly:
    the parameter is returned by reference with no data movement at all.
    materialize=True produces a bit-exact copy via one HBM->HBM DMA (useful if
    downstream code requires a distinct buffer).
    """
    if not materialize:
        # True PyTorch semantics: alias, not copy.  O(1) on every generation.
        return pred_param
    return _materialize_copy(pred_param)


if __name__ == "__main__":
    # Deterministic "parameter" initialization (synthetic; no checkpoint load).
    # Original module: pred (C, H, W) -> unsqueeze(0) -> (1, C, H, W) Parameter.
    key = jax.random.PRNGKey(0)
    C, H, W = 4, 16, 16
    pred = jax.random.normal(key, (C, H, W), dtype=jnp.float32)
    pred = pred[None, ...]  # unsqueeze(0) -> (1, 4, 16, 16)

    # Default (aliasing) forward — matches `return self.pred`.
    out_alias = percept_model_forward(pred)
    out_alias = jax.block_until_ready(out_alias)
    assert out_alias.shape == (1, C, H, W), out_alias.shape
    assert out_alias.dtype == pred.dtype
    assert bool(jnp.all(out_alias == pred))

    # Materializing Pallas kernel path (single HBM->HBM DMA), run once.
    out_copy = percept_model_forward(pred, materialize=True)
    out_copy = jax.block_until_ready(out_copy)
    assert out_copy.shape == (1, C, H, W), out_copy.shape
    assert out_copy.dtype == pred.dtype
    assert bool(jnp.all(out_copy == pred))

    print("KERNEL_OK")
</pallas_src>

<mosaic_0001>
module attributes {stable_mosaic.version = 11 : i64} {
  func.func @_param_copy_kernel(%arg0: memref<1x4x16x16xf32, #tpu.memory_space<any>>, %arg1: memref<1x4x16x16xf32, #tpu.memory_space<any>>, %arg2: memref<!tpu.dma_semaphore, #tpu.memory_space<semaphore_mem>>) attributes {dimension_semantics = [], scalar_prefetch = 0 : i64, scratch_operands = 1 : i64, tpu.core_type = #tpu.core_type<tc>} {
    tpu.enqueue_dma source(%arg0 : memref<1x4x16x16xf32, #tpu.memory_space<any>>) target(%arg1 : memref<1x4x16x16xf32, #tpu.memory_space<any>>) target_semaphore(%arg2 : memref<!tpu.dma_semaphore, #tpu.memory_space<semaphore_mem>>)
    tpu.wait_dma2 semaphore(%arg2 : memref<!tpu.dma_semaphore, #tpu.memory_space<semaphore_mem>>) src(%arg0 : memref<1x4x16x16xf32, #tpu.memory_space<any>>) dst(%arg1 : memref<1x4x16x16xf32, #tpu.memory_space<any>>)
    return
  }
}

</mosaic_0001>

<bundles_post_ra>
// kernel: _materialize_copy.1
= control target key start
LH: loop header
LB: loop body
LE: loop exit
PB: predicated region body
PF: predicated region fallthrough
CT: control target
= control target key end

     0   :  { %s30_s6 = smov [#allocation2]   ;;  %s31_s7 = smov 131072   ;;  %s49_s0 = inlined_call_operand.hbm [shape: f32[1,4,16,16], index: 0, kind: input, shape index: {}]   ;;  %s50_s1 = inlined_call_operand.hbm [shape: f32[1,4,16,16], index: 1, kind: output, shape index: {}]  }
   0x1   :  { %s32_s8 = smov 0  }
   0x2   :  { %12 = dma.general %s49_s0, 1024, %s50_s1, %s30_s6, %s31_s7, [#allocation4], %s32_s8, 0  }
   0x3   :  { %28 = dma.done.wait [#allocation2], 1024 }
   0x4   :  { %29 = vsyncadd [#allocation2], 4294966272 }
   0x5   :  { %18 = vsyncmov [#allocation2] }
   0x8   :  { %s19_s13 = vpop.sfrf %18 }
   0x9   :  { %p24_p0 = scmp.ne.s32.totalorder %s19_s13, 0 }
   0xb   :  { %23 = shalt.err (%p24_p0)  }

</bundles_post_ra>
